<compile_context>
chip_gen: v5e
topology: v5e:2x2
jax: 0.10.0
libtpu: 0.0.40
codegen_flags: <defaults>
</compile_context>

<pallas_src>
import jax
import jax.numpy as jnp
import numpy as np
from jax.experimental import pallas as pl
from jax.experimental.pallas import tpu as pltpu


def _round_up(x, m):
    return (x + m - 1) // m * m


def _attention_fusion_kernel(img_ref, txt_ref, wqkv_ref, bqkv_ref,
                             seg_s_ref, seg_t_ref, wo_ref, bo_ref, o_ref):
    DP = img_ref.shape[1]          # packed feature width (PACK * D; 128 when D == 32)

    w_qkv = wqkv_ref[...]          # (DP, 3*DP)  columns grouped [Q-pack | K-pack | V-pack]
    b_qkv = bqkv_ref[...]          # (1, 3*DP)
    w_o = wo_ref[...]              # (DP, DP)    kron(I_PACK, 0.5 * Wo^T): seq-mean pre-folded
    seg_s = seg_s_ref[...]         # (DP, PACK*H) head-sum matrix, 1/sqrt(head_dim) pre-folded
    seg_t = seg_t_ref[...]         # (PACK*H, DP) head-broadcast matrix

    xi = img_ref[...]              # (TBp, DP)
    xt = txt_ref[...]

    # ---- fused QKV projection, one dot per token (no sublane concat / slice copies) ----
    qkv_i = jnp.dot(xi.astype(w_qkv.dtype), w_qkv,
                    preferred_element_type=jnp.float32) + b_qkv        # (TBp, 3*DP) f32
    qkv_t = jnp.dot(xt.astype(w_qkv.dtype), w_qkv,
                    preferred_element_type=jnp.float32) + b_qkv
    qi, ki, vi = qkv_i[:, :DP], qkv_i[:, DP:2 * DP], qkv_i[:, 2 * DP:]  # 128-lane aligned views
    qt, kt, vt = qkv_t[:, :DP], qkv_t[:, DP:2 * DP], qkv_t[:, 2 * DP:]

    # ---- per-head scores: four (TBp, DP) @ (DP, PACK*H) dots; softmax scale folded in seg_s ----
    s_ii = jnp.dot(qi * ki, seg_s, preferred_element_type=jnp.float32)  # img query vs img key
    s_it = jnp.dot(qi * kt, seg_s, preferred_element_type=jnp.float32)  # img query vs txt key
    s_ti = jnp.dot(qt * ki, seg_s, preferred_element_type=jnp.float32)  # txt query vs img key
    s_tt = jnp.dot(qt * kt, seg_s, preferred_element_type=jnp.float32)  # txt query vs txt key

    # ---- exact 2-way softmax: p_a = sigmoid(s_a - s_b) = 1 / (1 + exp(s_b - s_a)) ----
    p_ii = 1.0 / (1.0 + jnp.exp(s_it - s_ii))
    p_ti = 1.0 / (1.0 + jnp.exp(s_tt - s_ti))
    p_it = 1.0 - p_ii
    p_tt = 1.0 - p_ti

    # ---- value mix with the sequence mean pulled in front of the output projection:
    #      a_img + a_txt = bcast(p_ii + p_ti) * v_img + bcast(p_it + p_tt) * v_txt ----
    g_i = jnp.dot(p_ii + p_ti, seg_t, preferred_element_type=jnp.float32)   # (TBp, DP)
    g_t = jnp.dot(p_it + p_tt, seg_t, preferred_element_type=jnp.float32)
    a_sum = g_i * vi + g_t * vt                                             # (TBp, DP)

    # ---- output projection; w_o already holds 0.5 * Wo^T, so this IS attn_output.mean(dim=1) ----
    o_ref[...] = jnp.dot(a_sum.astype(w_o.dtype), w_o,
                         preferred_element_type=jnp.float32) + bo_ref[...]


def attention_fusion(image_features, text_features, params, num_heads=8,
                     block_batch=4096, use_bf16=False):
    B, D = image_features.shape
    assert D % num_heads == 0
    hd = D // num_heads
    f32 = jnp.float32

    # Lane packing: put PACK batch rows into one 128-lane vreg row when D divides 128.
    PACK = 128 // D if (D <= 128 and 128 % D == 0) else 1
    DP = PACK * D

    img = image_features.astype(f32)
    txt = text_features.astype(f32)

    # Batch tiling: TB rows per grid step, multiple of 8*PACK for sublane/lane alignment.
    # Cap TB at ceil(B/2) (rounded) so the grid keeps >= 2 steps on v7x when B is large; pad the
    # batch so it divides evenly and slice the padding off afterwards (zero rows are harmless).
    row_align = 8 * PACK
    TB = min(block_batch, _round_up(-(-B // 2), row_align))
    TB = _round_up(TB, row_align)
    Bp = _round_up(B, TB)
    if Bp != B:
        pad = ((0, Bp - B), (0, 0))
        img = jnp.pad(img, pad)
        txt = jnp.pad(txt, pad)
    TBp = TB // PACK

    # Contiguous (free) reshape: PACK batch rows share one packed row.
    img_p = img.reshape(Bp // PACK, DP)
    txt_p = txt.reshape(Bp // PACK, DP)

    # PyTorch nn.MultiheadAttention parameter layout -> right-multiply, lane-packed form.
    in_w = jnp.asarray(params["in_proj_weight"], f32)      # (3D, D): rows [Wq; Wk; Wv]
    in_b = jnp.asarray(params["in_proj_bias"], f32)        # (3D,)
    eye = jnp.eye(PACK, dtype=f32)

    def packed(w):                                         # (M, N) -> (PACK*M, PACK*N) block-diag
        return jnp.kron(eye, w)

    wq_t, wk_t, wv_t = in_w[:D].T, in_w[D:2 * D].T, in_w[2 * D:].T
    wqkv = jnp.concatenate([packed(wq_t), packed(wk_t), packed(wv_t)], axis=1)  # (DP, 3*DP)
    bq, bk, bv = in_b[:D], in_b[D:2 * D], in_b[2 * D:]
    bqkv = jnp.concatenate([jnp.tile(bq, PACK), jnp.tile(bk, PACK),
                            jnp.tile(bv, PACK)]).reshape(1, 3 * DP)
    wo = packed(0.5 * jnp.asarray(params["out_proj_weight"], f32).T)            # (DP, DP)
    bo = jnp.tile(jnp.asarray(params["out_proj_bias"], f32), PACK).reshape(1, DP)

    # Head-membership (segment) matrices; softmax scale folded into seg_s.
    d_idx = np.arange(D)[:, None]
    h_idx = np.arange(num_heads)[None, :]
    seg = (d_idx // hd == h_idx).astype(np.float32)                             # (D, H)
    seg_s = packed(jnp.asarray(seg / np.sqrt(hd), f32))                         # (DP, PACK*H)
    seg_t = packed(jnp.asarray(seg.T, f32))                                     # (PACK*H, DP)

    if use_bf16:                       # bf16 MXU weight path (v6e/v7x); f32 accumulation/softmax
        wqkv = wqkv.astype(jnp.bfloat16)
        wo = wo.astype(jnp.bfloat16)

    batch_spec = pl.BlockSpec((TBp, DP), lambda i: (i, 0))
    const = lambda shape: pl.BlockSpec(shape, lambda i: (0, 0))   # VMEM-resident constants

    out_p = pl.pallas_call(
        _attention_fusion_kernel,
        out_shape=jax.ShapeDtypeStruct((Bp // PACK, DP), f32),
        grid=(Bp // TB,),
        in_specs=[batch_spec, batch_spec,
                  const((DP, 3 * DP)), const((1, 3 * DP)),
                  const((DP, PACK * num_heads)), const((PACK * num_heads, DP)),
                  const((DP, DP)), const((1, DP))],
        out_specs=batch_spec,
        compiler_params=pltpu.CompilerParams(
            dimension_semantics=("parallel",),
            vmem_limit_bytes=48 * 1024 * 1024),
    )(img_p, txt_p, wqkv, bqkv, seg_s, seg_t, wo, bo)

    return out_p.reshape(Bp, D)[:B]


def _reference(image_features, text_features, params, num_heads):
    """Pure-JAX replica of nn.MultiheadAttention(batch_first=True) self-attn + mean(1)."""
    B, D = image_features.shape
    hd = D // num_heads
    x = jnp.stack([image_features, text_features], axis=1).astype(jnp.float32)  # (B, 2, D)
    qkv = x @ params["in_proj_weight"].T + params["in_proj_bias"]                # (B, 2, 3D)
    q, k, v = jnp.split(qkv, 3, axis=-1)

    def heads(t):
        return t.reshape(B, 2, num_heads, hd).transpose(0, 2, 1, 3)

    qh, kh, vh = heads(q), heads(k), heads(v)
    scores = jnp.einsum('bhid,bhjd->bhij', qh, kh) / (hd ** 0.5)
    p = jax.nn.softmax(scores, axis=-1)
    ah = jnp.einsum('bhij,bhjd->bhid', p, vh)
    a = ah.transpose(0, 2, 1, 3).reshape(B, 2, D)
    out = a @ params["out_proj_weight"].T + params["out_proj_bias"]
    return out.mean(axis=1)


def init_params(key, feature_dim):
    D = feature_dim
    k1, k2, k3, k4 = jax.random.split(key, 4)
    bound_in = (6.0 / (3 * D + D)) ** 0.5            # xavier_uniform, as in PyTorch init
    bound_out = (1.0 / D) ** 0.5
    return {
        "in_proj_weight": jax.random.uniform(k1, (3 * D, D), jnp.float32, -bound_in, bound_in),
        "in_proj_bias": 0.1 * jax.random.normal(k2, (3 * D,), jnp.float32),
        "out_proj_weight": jax.random.uniform(k3, (D, D), jnp.float32, -bound_out, bound_out),
        "out_proj_bias": 0.1 * jax.random.normal(k4, (D,), jnp.float32),
    }


if __name__ == "__main__":
    B, D, H = 2, 32, 8                                # feature_dim=32, num_heads=8
    key = jax.random.PRNGKey(0)
    k_img, k_txt, k_par = jax.random.split(key, 3)
    image_features = jax.random.normal(k_img, (B, D), jnp.float32)
    text_features = jax.random.normal(k_txt, (B, D), jnp.float32)
    params = init_params(k_par, D)

    result = attention_fusion(image_features, text_features, params, num_heads=H)
    result = jax.block_until_ready(result)

    expected = _reference(image_features, text_features, params, num_heads=H)
    # Exact sigmoid-form softmax (no approx reciprocal) -> tight tolerance again.
    np.testing.assert_allclose(np.asarray(result), np.asarray(expected), rtol=2e-4, atol=1e-5)

    print("KERNEL_OK")
</pallas_src>

<mosaic_0001>
module attributes {stable_mosaic.version = 11 : i64} {
  func.func @_attention_fusion_kernel(%arg0: i32, %arg1: memref<8x128xf32, #tpu.memory_space<vmem>>, %arg2: memref<8x128xf32, #tpu.memory_space<vmem>>, %arg3: memref<128x384xf32, #tpu.memory_space<vmem>>, %arg4: memref<1x384xf32, #tpu.memory_space<vmem>>, %arg5: memref<128x32xf32, #tpu.memory_space<vmem>>, %arg6: memref<32x128xf32, #tpu.memory_space<vmem>>, %arg7: memref<128x128xf32, #tpu.memory_space<vmem>>, %arg8: memref<1x128xf32, #tpu.memory_space<vmem>>, %arg9: memref<8x128xf32, #tpu.memory_space<vmem>>) attributes {dimension_semantics = [#tpu.dimension_semantics<parallel>], iteration_bounds = array<i64: 1>, scalar_prefetch = 0 : i64, scratch_operands = 0 : i64, tpu.core_type = #tpu.core_type<tc>, window_params = [{transform_indices = @transform_0, window_bounds = array<i64: 8, 128>}, {transform_indices = @transform_1, window_bounds = array<i64: 8, 128>}, {pipeline_mode = #tpu.pipeline_mode<synchronous>, transform_indices = @transform_2, window_bounds = array<i64: 128, 384>}, {pipeline_mode = #tpu.pipeline_mode<synchronous>, transform_indices = @transform_3, window_bounds = array<i64: 1, 384>}, {pipeline_mode = #tpu.pipeline_mode<synchronous>, transform_indices = @transform_4, window_bounds = array<i64: 128, 32>}, {pipeline_mode = #tpu.pipeline_mode<synchronous>, transform_indices = @transform_5, window_bounds = array<i64: 32, 128>}, {pipeline_mode = #tpu.pipeline_mode<synchronous>, transform_indices = @transform_6, window_bounds = array<i64: 128, 128>}, {pipeline_mode = #tpu.pipeline_mode<synchronous>, transform_indices = @transform_7, window_bounds = array<i64: 1, 128>}, {transform_indices = @transform_8, window_bounds = array<i64: 8, 128>}]} {
    %c0 = arith.constant 0 : index
    %c0_0 = arith.constant 0 : index
    %0 = vector.load %arg3[%c0, %c0_0] : memref<128x384xf32, #tpu.memory_space<vmem>>, vector<128x384xf32>
    %c0_1 = arith.constant 0 : index
    %c0_2 = arith.constant 0 : index
    %1 = vector.load %arg4[%c0_1, %c0_2] : memref<1x384xf32, #tpu.memory_space<vmem>>, vector<1x384xf32>
    %c0_3 = arith.constant 0 : index
    %c0_4 = arith.constant 0 : index
    %2 = vector.load %arg7[%c0_3, %c0_4] : memref<128x128xf32, #tpu.memory_space<vmem>>, vector<128x128xf32>
    %c0_5 = arith.constant 0 : index
    %c0_6 = arith.constant 0 : index
    %3 = vector.load %arg5[%c0_5, %c0_6] : memref<128x32xf32, #tpu.memory_space<vmem>>, vector<128x32xf32>
    %c0_7 = arith.constant 0 : index
    %c0_8 = arith.constant 0 : index
    %4 = vector.load %arg6[%c0_7, %c0_8] : memref<32x128xf32, #tpu.memory_space<vmem>>, vector<32x128xf32>
    %c0_9 = arith.constant 0 : index
    %c0_10 = arith.constant 0 : index
    %5 = vector.load %arg1[%c0_9, %c0_10] : memref<8x128xf32, #tpu.memory_space<vmem>>, vector<8x128xf32>
    %c0_11 = arith.constant 0 : index
    %c0_12 = arith.constant 0 : index
    %6 = vector.load %arg2[%c0_11, %c0_12] : memref<8x128xf32, #tpu.memory_space<vmem>>, vector<8x128xf32>
    %cst = arith.constant dense<0.000000e+00> : vector<8x384xf32>
    %7 = tpu.matmul %5, %0, %cst {dimension_numbers = #tpu.dot_dimension_numbers<[1], [0], [0], [1], [0, 0, 1, 1], [], []>} : vector<8x128xf32>, vector<128x384xf32>, vector<8x384xf32> -> vector<8x384xf32>
    %8 = vector.broadcast %1 : vector<1x384xf32> to vector<8x384xf32>
    %9 = arith.addf %7, %8 : vector<8x384xf32>
    %cst_13 = arith.constant dense<0.000000e+00> : vector<8x384xf32>
    %10 = tpu.matmul %6, %0, %cst_13 {dimension_numbers = #tpu.dot_dimension_numbers<[1], [0], [0], [1], [0, 0, 1, 1], [], []>} : vector<8x128xf32>, vector<128x384xf32>, vector<8x384xf32> -> vector<8x384xf32>
    %11 = vector.broadcast %1 : vector<1x384xf32> to vector<8x384xf32>
    %12 = arith.addf %10, %11 : vector<8x384xf32>
    %13 = vector.extract_strided_slice %9 {offsets = [0, 0], sizes = [8, 128], strides = [1, 1]} : vector<8x384xf32> to vector<8x128xf32>
    %14 = vector.extract_strided_slice %9 {offsets = [0, 128], sizes = [8, 128], strides = [1, 1]} : vector<8x384xf32> to vector<8x128xf32>
    %15 = vector.extract_strided_slice %9 {offsets = [0, 256], sizes = [8, 128], strides = [1, 1]} : vector<8x384xf32> to vector<8x128xf32>
    %16 = vector.extract_strided_slice %12 {offsets = [0, 0], sizes = [8, 128], strides = [1, 1]} : vector<8x384xf32> to vector<8x128xf32>
    %17 = vector.extract_strided_slice %12 {offsets = [0, 128], sizes = [8, 128], strides = [1, 1]} : vector<8x384xf32> to vector<8x128xf32>
    %18 = vector.extract_strided_slice %12 {offsets = [0, 256], sizes = [8, 128], strides = [1, 1]} : vector<8x384xf32> to vector<8x128xf32>
    %19 = arith.mulf %13, %14 : vector<8x128xf32>
    %cst_14 = arith.constant dense<0.000000e+00> : vector<8x32xf32>
    %20 = tpu.matmul %19, %3, %cst_14 {dimension_numbers = #tpu.dot_dimension_numbers<[1], [0], [0], [1], [0, 0, 1, 1], [], []>} : vector<8x128xf32>, vector<128x32xf32>, vector<8x32xf32> -> vector<8x32xf32>
    %21 = arith.mulf %13, %17 : vector<8x128xf32>
    %cst_15 = arith.constant dense<0.000000e+00> : vector<8x32xf32>
    %22 = tpu.matmul %21, %3, %cst_15 {dimension_numbers = #tpu.dot_dimension_numbers<[1], [0], [0], [1], [0, 0, 1, 1], [], []>} : vector<8x128xf32>, vector<128x32xf32>, vector<8x32xf32> -> vector<8x32xf32>
    %23 = arith.mulf %16, %14 : vector<8x128xf32>
    %cst_16 = arith.constant dense<0.000000e+00> : vector<8x32xf32>
    %24 = tpu.matmul %23, %3, %cst_16 {dimension_numbers = #tpu.dot_dimension_numbers<[1], [0], [0], [1], [0, 0, 1, 1], [], []>} : vector<8x128xf32>, vector<128x32xf32>, vector<8x32xf32> -> vector<8x32xf32>
    %25 = arith.mulf %16, %17 : vector<8x128xf32>
    %cst_17 = arith.constant dense<0.000000e+00> : vector<8x32xf32>
    %26 = tpu.matmul %25, %3, %cst_17 {dimension_numbers = #tpu.dot_dimension_numbers<[1], [0], [0], [1], [0, 0, 1, 1], [], []>} : vector<8x128xf32>, vector<128x32xf32>, vector<8x32xf32> -> vector<8x32xf32>
    %27 = arith.subf %22, %20 : vector<8x32xf32>
    %28 = math.exp %27 : vector<8x32xf32>
    %cst_18 = arith.constant 1.000000e+00 : f32
    %29 = vector.broadcast %cst_18 : f32 to vector<8x32xf32>
    %30 = arith.addf %29, %28 : vector<8x32xf32>
    %cst_19 = arith.constant 1.000000e+00 : f32
    %31 = vector.broadcast %cst_19 : f32 to vector<8x32xf32>
    %32 = arith.divf %31, %30 : vector<8x32xf32>
    %33 = arith.subf %26, %24 : vector<8x32xf32>
    %34 = math.exp %33 : vector<8x32xf32>
    %cst_20 = arith.constant 1.000000e+00 : f32
    %35 = vector.broadcast %cst_20 : f32 to vector<8x32xf32>
    %36 = arith.addf %35, %34 : vector<8x32xf32>
    %cst_21 = arith.constant 1.000000e+00 : f32
    %37 = vector.broadcast %cst_21 : f32 to vector<8x32xf32>
    %38 = arith.divf %37, %36 : vector<8x32xf32>
    %cst_22 = arith.constant 1.000000e+00 : f32
    %39 = vector.broadcast %cst_22 : f32 to vector<8x32xf32>
    %40 = arith.subf %39, %32 : vector<8x32xf32>
    %cst_23 = arith.constant 1.000000e+00 : f32
    %41 = vector.broadcast %cst_23 : f32 to vector<8x32xf32>
    %42 = arith.subf %41, %38 : vector<8x32xf32>
    %43 = arith.addf %32, %38 : vector<8x32xf32>
    %cst_24 = arith.constant dense<0.000000e+00> : vector<8x128xf32>
    %44 = tpu.matmul %43, %4, %cst_24 {dimension_numbers = #tpu.dot_dimension_numbers<[1], [0], [0], [1], [0, 0, 1, 1], [], []>} : vector<8x32xf32>, vector<32x128xf32>, vector<8x128xf32> -> vector<8x128xf32>
    %45 = arith.addf %40, %42 : vector<8x32xf32>
    %cst_25 = arith.constant dense<0.000000e+00> : vector<8x128xf32>
    %46 = tpu.matmul %45, %4, %cst_25 {dimension_numbers = #tpu.dot_dimension_numbers<[1], [0], [0], [1], [0, 0, 1, 1], [], []>} : vector<8x32xf32>, vector<32x128xf32>, vector<8x128xf32> -> vector<8x128xf32>
    %47 = arith.mulf %44, %15 : vector<8x128xf32>
    %48 = arith.mulf %46, %18 : vector<8x128xf32>
    %49 = arith.addf %47, %48 : vector<8x128xf32>
    %cst_26 = arith.constant dense<0.000000e+00> : vector<8x128xf32>
    %50 = tpu.matmul %49, %2, %cst_26 {dimension_numbers = #tpu.dot_dimension_numbers<[1], [0], [0], [1], [0, 0, 1, 1], [], []>} : vector<8x128xf32>, vector<128x128xf32>, vector<8x128xf32> -> vector<8x128xf32>
    %c0_27 = arith.constant 0 : index
    %c0_28 = arith.constant 0 : index
    %51 = vector.load %arg8[%c0_27, %c0_28] : memref<1x128xf32, #tpu.memory_space<vmem>>, vector<1x128xf32>
    %52 = vector.broadcast %51 : vector<1x128xf32> to vector<8x128xf32>
    %53 = arith.addf %50, %52 : vector<8x128xf32>
    %c0_29 = arith.constant 0 : index
    %c0_30 = arith.constant 0 : index
    %54 = vector.load %arg9[%c0_29, %c0_30] : memref<8x128xf32, #tpu.memory_space<vmem>>, vector<8x128xf32>
    tpu.vector_store %arg9[%c0_29, %c0_30], %53 {strides = array<i32>} : memref<8x128xf32, #tpu.memory_space<vmem>>, vector<8x128xf32>,
    return
  }
  func.func @transform_0(%arg0: i32) -> (i32, i32) {
    %c0_i32 = arith.constant 0 : i32
    %c0_i32_0 = arith.constant 0 : i32
    return %arg0, %c0_i32 : i32, i32
  }
  func.func @transform_1(%arg0: i32) -> (i32, i32) {
    %c0_i32 = arith.constant 0 : i32
    %c0_i32_0 = arith.constant 0 : i32
    return %arg0, %c0_i32 : i32, i32
  }
  func.func @transform_2(%arg0: i32) -> (i32, i32) {
    %c0_i32 = arith.constant 0 : i32
    %c0_i32_0 = arith.constant 0 : i32
    %c0_i32_1 = arith.constant 0 : i32
    return %c0_i32, %c0_i32_0 : i32, i32
  }
  func.func @transform_3(%arg0: i32) -> (i32, i32) {
    %c0_i32 = arith.constant 0 : i32
    %c0_i32_0 = arith.constant 0 : i32
    %c0_i32_1 = arith.constant 0 : i32
    return %c0_i32, %c0_i32_0 : i32, i32
  }
  func.func @transform_4(%arg0: i32) -> (i32, i32) {
    %c0_i32 = arith.constant 0 : i32
    %c0_i32_0 = arith.constant 0 : i32
    %c0_i32_1 = arith.constant 0 : i32
    return %c0_i32, %c0_i32_0 : i32, i32
  }
  func.func @transform_5(%arg0: i32) -> (i32, i32) {
    %c0_i32 = arith.constant 0 : i32
    %c0_i32_0 = arith.constant 0 : i32
    %c0_i32_1 = arith.constant 0 : i32
    return %c0_i32, %c0_i32_0 : i32, i32
  }
  func.func @transform_6(%arg0: i32) -> (i32, i32) {
    %c0_i32 = arith.constant 0 : i32
    %c0_i32_0 = arith.constant 0 : i32
    %c0_i32_1 = arith.constant 0 : i32
    return %c0_i32, %c0_i32_0 : i32, i32
  }
  func.func @transform_7(%arg0: i32) -> (i32, i32) {
    %c0_i32 = arith.constant 0 : i32
    %c0_i32_0 = arith.constant 0 : i32
    %c0_i32_1 = arith.constant 0 : i32
    return %c0_i32, %c0_i32_0 : i32, i32
  }
  func.func @transform_8(%arg0: i32) -> (i32, i32) {
    %c0_i32 = arith.constant 0 : i32
    %c0_i32_0 = arith.constant 0 : i32
    return %arg0, %c0_i32 : i32, i32
  }
}

</mosaic_0001>

<bundles_post_ra>
// kernel: tpu_custom_call.1
= control target key start
LH: loop header
LB: loop body
LE: loop exit
PB: predicated region body
PF: predicated region fallthrough
CT: control target
= control target key end

     0   :  { %13 = vsyncpa [#allocation3], 0  ;;  %s941_s0 = inlined_call_operand.hbm [shape: f32[8,128], index: 0, kind: input, shape index: {}]   ;;  %s942_s1 = inlined_call_operand.hbm [shape: f32[8,128], index: 1, kind: input, shape index: {}]   ;;  %s943_s2 = inlined_call_operand.hbm [shape: f32[128,384], index: 2, kind: input, shape index: {}]   ;;  %s944_s3 = inlined_call_operand.vmem [shape: f32[1,384], index: 3, kind: input, shape index: {}]   ;;  %s945_s4 = inlined_call_operand.vmem [shape: f32[128,32], index: 4, kind: input, shape index: {}]   ;;  %s946_s5 = inlined_call_operand.vmem [shape: f32[32,128], index: 5, kind: input, shape index: {}]   ;;  %s947_s6 = inlined_call_operand.vmem [shape: f32[128,128], index: 6, kind: input, shape index: {}]   ;;  %s948_s7 = inlined_call_operand.vmem [shape: f32[1,128], index: 7, kind: input, shape index: {}]   ;;  %s949_s8 = inlined_call_operand.hbm [shape: f32[8,128], index: 8, kind: output, shape index: {}]  }
   0x1   :  { %14 = vsyncpa [#allocation6], 0  ;;  %s32_s29 = sshll.u32 %s942_s1, 4  ;;  %s33_s29 = int_to_ptr.hbm [resolvable:$true] %s32_s29 }
   0x2   :  { %15 = vsyncpa [#allocation4], 0  ;;  %s625_s30 = smov [#allocation5]   ;;  %s21_s12 = sshll.u32 %s941_s0, 4  ;;  %s22_s12 = int_to_ptr.hbm [resolvable:$true] %s21_s12 }
   0x3   :  { %s34_s9 = sshll.u32 %s625_s30, 4  ;;  %s626_s13 = smov [#allocation2]   ;;  %s35_s9 = int_to_ptr.vmem [resolvable:$true] %s34_s9 }
   0x4   :  { %37 = dma.hbm_to_vmem [thread:$0]  %s33_s29, 128, %s35_s9, [#allocation6]  }
   0x5   :  { %s23_s14 = sshll.u32 %s626_s13, 4  ;;  %s42_s17 = sshll.u32 %s943_s2, 4  ;;  %s24_s14 = int_to_ptr.vmem [resolvable:$true] %s23_s14  ;;  %s43_s17 = int_to_ptr.hbm [resolvable:$true] %s42_s17 }
   0x6   :  { %26 = dma.hbm_to_vmem [thread:$0]  %s22_s12, 128, %s24_s14, [#allocation3]  }
   0x7   :  { %s627_s1 = smov [#allocation7]   ;;  %s628_s19 = smov 384  }
   0x8   :  { %s44_s18 = sshll.u32 %s627_s1, 4  ;;  %s629_s20 = smov 24   ;;  %s45_s18 = int_to_ptr.vmem [resolvable:$true] %s44_s18 }
   0x9   :  { %50 = dma.hbm_to_vmem [thread:$0]  %s43_s17, 6144, %s45_s18, [#allocation6], %s628_s19, %s628_s19, %s629_s20  }
   0xa   :  { %619 = dma.done.wait [#allocation3], 128  }
   0xb   :  { %620 = vsyncadd [#allocation3], 4294967168 }
   0xc   :  { %621 = dma.done.wait [#allocation6], 6272  }
   0xd   :  { %622 = vsyncadd [#allocation6], 4294961024  ;;  %v118_v0 = vld [vmem:[#allocation7 + $0x168] sm:$0xff]  ;;  %v115_v1 = vld [vmem:[#allocation7 + $0x150] sm:$0xff]  ;;  %vm412_vm8 = vcmask 261120   ;;  %s630_s17 = smov [#allocation8]  }
   0xe   :  { %167 = vmatpush.msra.mxu0 %v118_v0  ;;  %227 = vmatpush.msra.mxu3 %v118_v0  ;;  %v112_v2 = vld [vmem:[#allocation7 + $0x138] sm:$0xff]  ;;  %v109_v3 = vld [vmem:[#allocation7 + $0x120] sm:$0xff]  ;;  %v685_v4 = vld [vmem:[#allocation7 + $0x170] sm:$0xff]  ;;  %s493_s1 = sshll.u32 %s630_s17, 4  ;;  %s495_s19 = sshll.u32 %s949_s8, 4  ;;  %s494_s1 = int_to_ptr.vmem [resolvable:$true] %s493_s1  ;;  %s496_s19 = int_to_ptr.hbm [resolvable:$true] %s495_s19 }
   0xf   :  { %v687_v5 = vld [vmem:[#allocation7 + $0x158] sm:$0xff]  ;;  %187 = vmatpush.msra.mxu1 %v685_v4  ;;  %v106_v6 = vld [vmem:[#allocation7 + $0x108] sm:$0xff]  ;;  %v690_v7 = vld [vmem:[#allocation7 + $0x140] sm:$0xff] }
  0x10   :  { %168 = vmatpush.msra.mxu0 %v115_v1  ;;  %228 = vmatpush.msra.mxu3 %v115_v1  ;;  %v103_v8 = vld [vmem:[#allocation7 + $0xf0] sm:$0xff]  ;;  %v693_v9 = vld [vmem:[#allocation7 + $0x128] sm:$0xff]  ;;  %v100_v10 = vld [vmem:[#allocation7 + $0xd8] sm:$0xff] }
  0x11   :  { %188 = vmatpush.msra.mxu1 %v687_v5  ;;  %v696_v11 = vld [vmem:[#allocation7 + $0x110] sm:$0xff]  ;;  %v97_v12 = vld [vmem:[#allocation7 + $0xc0] sm:$0xff]  ;;  %v699_v13 = vld [vmem:[#allocation7 + $0xf8] sm:$0xff] }
  0x12   :  { %169 = vmatpush.msra.mxu0 %v112_v2  ;;  %229 = vmatpush.msra.mxu3 %v112_v2  ;;  %v94_v14 = vld [vmem:[#allocation7 + $0xa8] sm:$0xff]  ;;  %v702_v15 = vld [vmem:[#allocation7 + $0xe0] sm:$0xff]  ;;  %v91_v16 = vld [vmem:[#allocation7 + $0x90] sm:$0xff] }
  0x13   :  { %189 = vmatpush.msra.mxu1 %v690_v7  ;;  %v705_v17 = vld [vmem:[#allocation7 + $0xc8] sm:$0xff]  ;;  %v88_v18 = vld [vmem:[#allocation7 + $0x78] sm:$0xff]  ;;  %v708_v19 = vld [vmem:[#allocation7 + $0xb0] sm:$0xff] }
  0x14   :  { %170 = vmatpush.msra.mxu0 %v109_v3  ;;  %230 = vmatpush.msra.mxu3 %v109_v3  ;;  %v85_v20 = vld [vmem:[#allocation7 + $0x60] sm:$0xff]  ;;  %v711_v21 = vld [vmem:[#allocation7 + $0x98] sm:$0xff]  ;;  %v82_v22 = vld [vmem:[#allocation7 + $0x48] sm:$0xff] }
  0x15   :  { %190 = vmatpush.msra.mxu1 %v693_v9  ;;  %v714_v23 = vld [vmem:[#allocation7 + $0x80] sm:$0xff]  ;;  %v79_v24 = vld [vmem:[#allocation7 + $0x30] sm:$0xff]  ;;  %v717_v25 = vld [vmem:[#allocation7 + $0x68] sm:$0xff] }
  0x16   :  { %171 = vmatpush.msra.mxu0 %v106_v6  ;;  %231 = vmatpush.msra.mxu3 %v106_v6  ;;  %v76_v26 = vld [vmem:[#allocation7 + $0x18] sm:$0xff]  ;;  %v720_v27 = vld [vmem:[#allocation7 + $0x50] sm:$0xff]  ;;  %v73_v28 = vld [vmem:[#allocation7] sm:$0xff] }
  0x17   :  { %191 = vmatpush.msra.mxu1 %v696_v11  ;;  %v723_v29 = vld [vmem:[#allocation7 + $0x38] sm:$0xff]  ;;  %v726_v30 = vld [vmem:[#allocation7 + $0x20] sm:$0xff]  ;;  %v728_v31 = vld [vmem:[#allocation2] sm:$0xff] }
  0x18   :  { %172 = vmatpush.msra.mxu0 %v103_v8  ;;  %232 = vmatpush.msra.mxu3 %v103_v8  ;;  %v731_v32 = vld [vmem:[#allocation5] sm:$0xff]  ;;  %v734_v33 = vld [vmem:[#allocation7 + $0x8] sm:$0xff]  ;;  %v117_v35 = vld [vmem:[#allocation7 + $0x160] sm:$0xff] }
  0x19   :  { %192 = vmatpush.msra.mxu1 %v699_v13  ;;  %v120_v34 = vld [vmem:[#allocation7 + $0x178] sm:$0xff]  ;;  %v114_v36 = vld [vmem:[#allocation7 + $0x148] sm:$0xff]  ;;  %v111_v38 = vld [vmem:[#allocation7 + $0x130] sm:$0xff] }
  0x1a   :  { %173 = vmatpush.msra.mxu0 %v100_v10  ;;  %233 = vmatpush.msra.mxu3 %v100_v10  ;;  %v746_v37 = vld [vmem:[%s945_s4 + $0x78] sm:$0xff]  ;;  %v753_v39 = vld [vmem:[%s945_s4 + $0x70] sm:$0xff]  ;;  %v108_v40 = vld [vmem:[#allocation7 + $0x118] sm:$0xff] }
  0x1b   :  { %193 = vmatpush.msra.mxu1 %v702_v15  ;;  %207 = vmatpush.msra.mxu2 %v120_v34  ;;  %v760_v41 = vld [vmem:[%s945_s4 + $0x68] sm:$0xff]  ;;  %v105_v42 = vld [vmem:[#allocation7 + $0x100] sm:$0xff]  ;;  %v767_v43 = vld [vmem:[%s945_s4 + $0x60] sm:$0xff] }
  0x1c   :  { %174 = vmatpush.msra.mxu0 %v97_v12  ;;  %234 = vmatpush.msra.mxu3 %v97_v12  ;;  %v102_v44 = vld [vmem:[#allocation7 + $0xe8] sm:$0xff]  ;;  %v99_v46 = vld [vmem:[#allocation7 + $0xd0] sm:$0xff]  ;;  %v781_v47 = vld [vmem:[%s945_s4 + $0x50] sm:$0xff] }
  0x1d   :  { %194 = vmatpush.msra.mxu1 %v705_v17  ;;  %208 = vmatpush.msra.mxu2 %v117_v35  ;;  %v774_v45 = vld [vmem:[%s945_s4 + $0x58] sm:$0xff]  ;;  %v96_v48 = vld [vmem:[#allocation7 + $0xb8] sm:$0xff]  ;;  %v93_v50 = vld [vmem:[#allocation7 + $0xa0] sm:$0xff] }
  0x1e   :  { %175 = vmatpush.msra.mxu0 %v94_v14  ;;  %235 = vmatpush.msra.mxu3 %v94_v14  ;;  %v788_v49 = vld [vmem:[%s945_s4 + $0x48] sm:$0xff]  ;;  %v795_v51 = vld [vmem:[%s945_s4 + $0x40] sm:$0xff]  ;;  %v90_v52 = vld [vmem:[#allocation7 + $0x88] sm:$0xff] }
  0x1f   :  { %195 = vmatpush.msra.mxu1 %v708_v19  ;;  %209 = vmatpush.msra.mxu2 %v114_v36  ;;  %v802_v53 = vld [vmem:[%s945_s4 + $0x38] sm:$0xff]  ;;  %v87_v54 = vld [vmem:[#allocation7 + $0x70] sm:$0xff]  ;;  %v144_v55 = vld [vmem:[%s945_s4 + $0x30] sm:$0xff] }
  0x20   :  { %176 = vmatpush.msra.mxu0 %v91_v16  ;;  %236 = vmatpush.msra.mxu3 %v91_v16  ;;  %v84_v56 = vld [vmem:[#allocation7 + $0x58] sm:$0xff]  ;;  %v81_v58 = vld [vmem:[#allocation7 + $0x40] sm:$0xff]  ;;  %v142_v59 = vld [vmem:[%s945_s4 + $0x20] sm:$0xff] }
  0x21   :  { %196 = vmatpush.msra.mxu1 %v711_v21  ;;  %210 = vmatpush.msra.mxu2 %v111_v38  ;;  %v143_v57 = vld [vmem:[%s945_s4 + $0x28] sm:$0xff]  ;;  %v78_v60 = vld [vmem:[#allocation7 + $0x28] sm:$0xff]  ;;  %v75_v62 = vld [vmem:[#allocation7 + $0x10] sm:$0xff] }
  0x22   :  { %177 = vmatpush.msra.mxu0 %v88_v18  ;;  %237 = vmatpush.msra.mxu3 %v88_v18  ;;  %v141_v61 = vld [vmem:[%s945_s4 + $0x18] sm:$0xff]  ;;  %v140_v63 = vld [vmem:[%s945_s4 + $0x10] sm:$0xff]  ;;  %v139_v0 = vld [vmem:[%s945_s4 + $0x8] sm:$0xff] }
  0x23   :  { %197 = vmatpush.msra.mxu1 %v714_v23  ;;  %211 = vmatpush.msra.mxu2 %v108_v40  ;;  %v138_v1 = vld [vmem:[%s945_s4] sm:$0xff] }
  0x24   :  { %178 = vmatpush.msra.mxu0 %v85_v20  ;;  %238 = vmatpush.msra.mxu3 %v85_v20  ;;  %v864_v2 = vld [vmem:[%s944_s3] sm:$0x7]  ;;  %v157_v20 = vld [vmem:[%s946_s5 + $0x18] sm:$0xff] }
  0x25   :  { %198 = vmatpush.msra.mxu1 %v717_v25  ;;  %212 = vmatpush.msra.mxu2 %v105_v42  ;;  %v161_v3 = vperm.slane %v864_v2, 0 }
  0x26   :  { %179 = vmatpush.msra.mxu0 %v82_v22  ;;  %239 = vmatpush.msra.mxu3 %v82_v22 }
  0x27   :  { %199 = vmatpush.msra.mxu1 %v720_v27  ;;  %213 = vmatpush.msra.mxu2 %v102_v44 }
  0x28   :  { %180 = vmatpush.msra.mxu0 %v79_v24  ;;  %240 = vmatpush.msra.mxu3 %v79_v24  ;;  %v155_v24 = vld [vmem:[%s946_s5 + $0x8] sm:$0xff] }
  0x29   :  { %200 = vmatpush.msra.mxu1 %v723_v29  ;;  %214 = vmatpush.msra.mxu2 %v99_v46 }
  0x2a   :  { %181 = vmatpush.msra.mxu0 %v76_v26  ;;  %241 = vmatpush.msra.mxu3 %v76_v26  ;;  %v154_v26 = vld [vmem:[%s946_s5] sm:$0xff] }
  0x2b   :  { %201 = vmatpush.msra.mxu1 %v726_v30  ;;  %215 = vmatpush.msra.mxu2 %v96_v48 }
  0x2c   :  { %182 = vmatpush.msra.mxu0 %v73_v28  ;;  %242 = vmatpush.msra.mxu3 %v73_v28 }
  0x2d   :  { %183 = vmatmul.f32.vlgmr.msra.gmra.mxu0 %v728_v31  ;;  %243 = vmatmul.f32.vlgmr.msra.gmra.mxu3 %v731_v32 }
  0x2e   :  { %247 = vmatpush.msrb.mxu0 %v685_v4  ;;  %202 = vmatpush.msra.mxu1 %v734_v33 }
  0x2f   :  { %203 = vmatmul.f32.vlgmr.msra.gmra.mxu1 %v728_v31  ;;  %309 = vmatpush.msrb.mxu3 %v746_v37 }
  0x30   :  { %248 = vmatpush.msrb.mxu0 %v687_v5  ;;  %267 = vmatpush.msrb.mxu1 %v120_v34  ;;  %v162_v5 = vperm.slane %v864_v2, 1  ;;  %v136_v34 = vld [vmem:[%s947_s6 + $0x70] sm:$0xff] }
  0x31   :  { %310 = vmatpush.msrb.mxu3 %v753_v39  ;;  %216 = vmatpush.msra.mxu2 %v93_v50 }
  0x32   :  { %249 = vmatpush.msrb.mxu0 %v690_v7  ;;  %268 = vmatpush.msrb.mxu1 %v117_v35 }
  0x33   :  { %311 = vmatpush.msrb.mxu3 %v760_v41  ;;  %217 = vmatpush.msra.mxu2 %v90_v52 }
  0x34   :  { %250 = vmatpush.msrb.mxu0 %v693_v9  ;;  %269 = vmatpush.msrb.mxu1 %v114_v36  ;;  %v135_v36 = vld [vmem:[%s947_s6 + $0x68] sm:$0xff] }
  0x35   :  { %312 = vmatpush.msrb.mxu3 %v767_v43  ;;  %218 = vmatpush.msra.mxu2 %v87_v54 }
  0x36   :  { %251 = vmatpush.msrb.mxu0 %v696_v11  ;;  %270 = vmatpush.msrb.mxu1 %v111_v38  ;;  %v134_v38 = vld [vmem:[%s947_s6 + $0x60] sm:$0xff] }
  0x37   :  { %313 = vmatpush.msrb.mxu3 %v774_v45  ;;  %219 = vmatpush.msra.mxu2 %v84_v56 }
  0x38   :  { %252 = vmatpush.msrb.mxu0 %v699_v13  ;;  %271 = vmatpush.msrb.mxu1 %v108_v40 }
  0x39   :  { %314 = vmatpush.msrb.mxu3 %v781_v47  ;;  %220 = vmatpush.msra.mxu2 %v81_v58 }
  0x3a   :  { %253 = vmatpush.msrb.mxu0 %v702_v15  ;;  %272 = vmatpush.msrb.mxu1 %v105_v42 }
  0x3b   :  { %315 = vmatpush.msrb.mxu3 %v788_v49  ;;  %221 = vmatpush.msra.mxu2 %v78_v60 }
  0x3c   :  { %254 = vmatpush.msrb.mxu0 %v705_v17  ;;  %273 = vmatpush.msrb.mxu1 %v102_v44 }
  0x3d   :  { %316 = vmatpush.msrb.mxu3 %v795_v51  ;;  %222 = vmatpush.msra.mxu2 %v75_v62 }
  0x3e   :  { %255 = vmatpush.msrb.mxu0 %v708_v19  ;;  %274 = vmatpush.msrb.mxu1 %v99_v46 }
  0x3f   :  { %317 = vmatpush.msrb.mxu3 %v802_v53  ;;  %288 = vmatpush.msrb.mxu2 %v746_v37 }
  0x40   :  { %256 = vmatpush.msrb.mxu0 %v711_v21  ;;  %275 = vmatpush.msrb.mxu1 %v96_v48  ;;  %v156_v21 = vld [vmem:[%s946_s5 + $0x10] sm:$0xff]  ;;  %v130_v48 = vld [vmem:[%s947_s6 + $0x40] sm:$0xff] }
  0x41   :  { %318 = vmatpush.msrb.mxu3 %v144_v55  ;;  %223 = vmatmul.f32.vlgmr.msra.gmra.mxu2 %v728_v31 }
  0x42   :  { %257 = vmatpush.msrb.mxu0 %v714_v23  ;;  %276 = vmatpush.msrb.mxu1 %v93_v50 }
  0x43   :  { %319 = vmatpush.msrb.mxu3 %v143_v57  ;;  %289 = vmatpush.msrb.mxu2 %v753_v39 }
  0x44   :  { %258 = vmatpush.msrb.mxu0 %v717_v25  ;;  %277 = vmatpush.msrb.mxu1 %v90_v52 }
  0x45   :  { %320 = vmatpush.msrb.mxu3 %v142_v59  ;;  %290 = vmatpush.msrb.mxu2 %v760_v41 }
  0x46   :  { %259 = vmatpush.msrb.mxu0 %v720_v27  ;;  %278 = vmatpush.msrb.mxu1 %v87_v54 }
  0x47   :  { %321 = vmatpush.msrb.mxu3 %v141_v61  ;;  %291 = vmatpush.msrb.mxu2 %v767_v43 }
  0x48   :  { %260 = vmatpush.msrb.mxu0 %v723_v29  ;;  %279 = vmatpush.msrb.mxu1 %v84_v56 }
  0x49   :  { %292 = vmatpush.msrb.mxu2 %v774_v45  ;;  %322 = vmatpush.msrb.mxu3 %v140_v63 }
  0x4a   :  { %261 = vmatpush.msrb.mxu0 %v726_v30  ;;  %280 = vmatpush.msrb.mxu1 %v81_v58 }
  0x4b   :  { %293 = vmatpush.msrb.mxu2 %v781_v47  ;;  %323 = vmatpush.msrb.mxu3 %v139_v0 }
  0x4c   :  { %262 = vmatpush.msrb.mxu0 %v734_v33  ;;  %281 = vmatpush.msrb.mxu1 %v78_v60  ;;  %v137_v33 = vld [vmem:[%s947_s6 + $0x78] sm:$0xff] }
  0x4d   :  { %263 = vmatmul.f32.vlgmr.msrb.gmra.mxu0 %v731_v32  ;;  %294 = vmatpush.msrb.mxu2 %v788_v49 }
  0x4e   :  { %330 = vmatpush.msra.mxu0 %v746_v37  ;;  %282 = vmatpush.msrb.mxu1 %v75_v62 }
  0x4f   :  { %283 = vmatmul.f32.vlgmr.msrb.gmra.mxu1 %v731_v32  ;;  %295 = vmatpush.msrb.mxu2 %v795_v51 }
  0x50   :  { %331 = vmatpush.msra.mxu0 %v753_v39  ;;  %351 = vmatpush.msra.mxu1 %v746_v37 }
  0x51   :  { %296 = vmatpush.msrb.mxu2 %v802_v53  ;;  %324 = vmatpush.msrb.mxu3 %v138_v1 }
  0x52   :  { %332 = vmatpush.msra.mxu0 %v760_v41  ;;  %352 = vmatpush.msra.mxu1 %v753_v39 }
  0x53   :  { %297 = vmatpush.msrb.mxu2 %v144_v55  ;;  %428 = vmatpush.msra.mxu3 %v157_v20 }
  0x54   :  { %333 = vmatpush.msra.mxu0 %v767_v43  ;;  %353 = vmatpush.msra.mxu1 %v760_v41  ;;  %v133_v41 = vld [vmem:[%s947_s6 + $0x58] sm:$0xff] }
  0x55   :  { %298 = vmatpush.msrb.mxu2 %v143_v57  ;;  %429 = vmatpush.msra.mxu3 %v156_v21 }
  0x56   :  { %334 = vmatpush.msra.mxu0 %v774_v45  ;;  %354 = vmatpush.msra.mxu1 %v767_v43  ;;  %v132_v43 = vld [vmem:[%s947_s6 + $0x50] sm:$0xff] }
  0x57   :  { %299 = vmatpush.msrb.mxu2 %v142_v59  ;;  %430 = vmatpush.msra.mxu3 %v155_v24 }
  0x58   :  { %335 = vmatpush.msra.mxu0 %v781_v47  ;;  %355 = vmatpush.msra.mxu1 %v774_v45  ;;  %v131_v45 = vld [vmem:[%s947_s6 + $0x48] sm:$0xff] }
  0x59   :  { %300 = vmatpush.msrb.mxu2 %v141_v61  ;;  %431 = vmatpush.msra.mxu3 %v154_v26 }
  0x5a   :  { %336 = vmatpush.msra.mxu0 %v788_v49  ;;  %356 = vmatpush.msra.mxu1 %v781_v47 }
  0x5b   :  { %301 = vmatpush.msrb.mxu2 %v140_v63 }
  0x5c   :  { %337 = vmatpush.msra.mxu0 %v795_v51  ;;  %357 = vmatpush.msra.mxu1 %v788_v49 }
  0x5d   :  { %302 = vmatpush.msrb.mxu2 %v139_v0 }
  0x5e   :  { %338 = vmatpush.msra.mxu0 %v802_v53  ;;  %358 = vmatpush.msra.mxu1 %v795_v51  ;;  %v129_v51 = vld [vmem:[%s947_s6 + $0x38] sm:$0xff] }
  0x5f   :  { %303 = vmatpush.msrb.mxu2 %v138_v1 }
  0x60   :  { %339 = vmatpush.msra.mxu0 %v144_v55  ;;  %359 = vmatpush.msra.mxu1 %v802_v53 }
  0x61   :  { %467 = vmatpush.msra.mxu2 %v137_v33 }
  0x62   :  { %340 = vmatpush.msra.mxu0 %v143_v57  ;;  %360 = vmatpush.msra.mxu1 %v144_v55 }
  0x63   :  { %468 = vmatpush.msra.mxu2 %v136_v34 }
  0x64   :  { %341 = vmatpush.msra.mxu0 %v142_v59  ;;  %361 = vmatpush.msra.mxu1 %v143_v57 }
  0x65   :  { %469 = vmatpush.msra.mxu2 %v135_v36 }
  0x66   :  { %342 = vmatpush.msra.mxu0 %v141_v61  ;;  %362 = vmatpush.msra.mxu1 %v142_v59 }
  0x67   :  { %470 = vmatpush.msra.mxu2 %v134_v38 }
  0x68   :  { %363 = vmatpush.msra.mxu1 %v141_v61  ;;  %343 = vmatpush.msra.mxu0 %v140_v63 }
  0x69   :  { %471 = vmatpush.msra.mxu2 %v133_v41 }
  0x6a   :  { %364 = vmatpush.msra.mxu1 %v140_v63  ;;  %344 = vmatpush.msra.mxu0 %v139_v0 }
  0x6b   :  { %472 = vmatpush.msra.mxu2 %v132_v43 }
  0x6c   :  { %365 = vmatpush.msra.mxu1 %v139_v0  ;;  %345 = vmatpush.msra.mxu0 %v138_v1 }
  0x6d   :  { %473 = vmatpush.msra.mxu2 %v131_v45 }
  0x6e   :  { %366 = vmatpush.msra.mxu1 %v138_v1 }
  0x6f   :  { %474 = vmatpush.msra.mxu2 %v130_v48 }
  0x71   :  { %475 = vmatpush.msra.mxu2 %v129_v51 }
  0xaa   :  { %v184_v4 = vpop.f32.mrf.mxu0 }
  0xab   :  { %v185_v6 = vadd.f32 %v184_v4, %v161_v3 }
  0xac   :  { %v204_v7 = vpop.f32.mrf.mxu1 }
  0xad   :  { %v205_v8 = vadd.f32 %v204_v7, %v162_v5  ;;  %v126_v7 = vld [vmem:[%s947_s6 + $0x20] sm:$0xff] }
  0xaf   :  { %v287_v9 = vmul.f32 %v205_v8, %v185_v6 }
  0xb0   :  { %v244_v10 = vpop.f32.mrf.mxu3 }
  0xb1   :  { %304 = vmatmul.f32.vlgmr.msrb.gmra.mxu2 %v287_v9  ;;  %v245_v11 = vadd.f32 %v244_v10, %v161_v3  ;;  %v124_v9 = vld [vmem:[%s947_s6 + $0x10] sm:$0xff]  ;;  %v123_v10 = vld [vmem:[%s947_s6 + $0x8] sm:$0xff] }
  0xb3   :  { %v329_v12 = vmul.f32 %v245_v11, %v205_v8  ;;  %v125_v8 = vld [vmem:[%s947_s6 + $0x18] sm:$0xff] }
  0xb5   :  { %346 = vmatmul.f32.vlgmr.msra.gmra.mxu0 %v329_v12 }
  0xc4   :  { %v870_v18 = vpop.f32.mrf.mxu2 }
  0xca   :  { %v264_v13 = vpop.f32.mrf.mxu0 }
  0xcb   :  { %v265_v14 = vadd.f32 %v264_v13, %v162_v5  ;;  %v128_v5 = vld [vmem:[%s947_s6 + $0x30] sm:$0xff]  ;;  %v163_v13 = vperm.slane %v864_v2, 2 }
  0xcc   :  { %v868_v17 = vpop.f32.mrf.mxu1  ;;  %476 = vmatpush.msra.mxu2 %v128_v5 }
  0xcd   :  { %v308_v15 = vmul.f32 %v265_v14, %v185_v6  ;;  %v350_v16 = vmul.f32 %v265_v14, %v245_v11  ;;  %v127_v6 = vld [vmem:[%s947_s6 + $0x28] sm:$0xff]  ;;  %v122_v11 = vld [vmem:[%s947_s6] sm:$0xff]  ;;  %v225_v14 = vadd.f32 %v870_v18, %v163_v13 }
  0xce   :  { %477 = vmatpush.msra.mxu2 %v127_v6 }
  0xcf   :  { %325 = vmatmul.f32.vlgmr.msrb.gmra.mxu3 %v308_v15  ;;  %367 = vmatmul.f32.vlgmr.msra.gmra.mxu1 %v350_v16  ;;  %v285_v15 = vadd.f32 %v868_v17, %v163_v13 }
  0xd0   :  { %452 = vmatpush.msrb.mxu3 %v157_v20  ;;  %478 = vmatpush.msra.mxu2 %v126_v7 }
  0xd2   :  { %453 = vmatpush.msrb.mxu3 %v156_v21  ;;  %479 = vmatpush.msra.mxu2 %v125_v8 }
  0xd4   :  { %454 = vmatpush.msrb.mxu3 %v155_v24  ;;  %480 = vmatpush.msra.mxu2 %v124_v9 }
  0xd6   :  { %455 = vmatpush.msrb.mxu3 %v154_v26  ;;  %481 = vmatpush.msra.mxu2 %v123_v10 }
  0xd8   :  { %482 = vmatpush.msra.mxu2 %v122_v11 }
 0x132   :  { %v347_v19 = vpop.f32.mrf.mxu0 }
 0x134   :  { %v305_v27 = vpop.f32.mrf.mxu2 }
 0x14c   :  { %v368_v22 = vpop.f32.mrf.mxu1 }
 0x14d   :  { %v390_v23 = vsub.f32 %v368_v22, %v347_v19  ;;  %v514_v22 = vld [vmem:[%s948_s7] ss:$0 sm:$0xff] }
 0x14f   :  { %v391_v25 = vmul.f32 1.442695, %v390_v23 }
 0x151   :  { %515 = vpow2.f32 %v391_v25 }
 0x152   :  { %v326_v28 = vpop.f32.mrf.mxu3 }
 0x153   :  { %v371_v29 = vsub.f32 %v326_v28, %v305_v27 }
 0x155   :  { %v372_v30 = vmul.f32 1.442695, %v371_v29 }
 0x157   :  { %v516_v31 = vpop.eup %515  ;;  %517 = vpow2.f32 %v372_v30 }
 0x158   :  { %v393_v32 = vadd.f32 1.0, %v516_v31 }
 0x15a   :  { %519 = vrcp.f32 %v393_v32  ;;  %vm399_vm1 = vweird.f32 %v393_v32  ;;  %v405_v52 = vand.u32 2147483648, %v393_v32  ;;  %v403_v56 = vand.u32 2147483647, %v393_v32 }
 0x15c   :  { %v406_v59 = vor.u32 1.1754944e-38, %v405_v52  ;;  %vm404_vm7 = vcmp.eq.f32.partialorder %v403_v56, 8.507059e+37 }
 0x15d   :  { %v518_v35 = vpop.eup %517 }
 0x15e   :  { %v374_v37 = vadd.f32 1.0, %v518_v35 }
 0x160   :  { %v520_v39 = vpop.eup %519  ;;  %521 = vrcp.f32 %v374_v37  ;;  %v386_v53 = vand.u32 2147483648, %v374_v37  ;;  %v384_v55 = vand.u32 2147483647, %v374_v37  ;;  %vm380_vm4 = vweird.f32 %v374_v37 }
 0x161   :  { %v395_v40 = vmul.f32 %v520_v39, %v393_v32  ;;  %vm400_vm0 = vweird.f32 %v520_v39 }
 0x162   :  { %vm401_vm3 = vmor %vm399_vm1, %vm400_vm0  ;;  %v387_v60 = vor.u32 1.1754944e-38, %v386_v53  ;;  %vm385_vm6 = vcmp.eq.f32.partialorder %v384_v55, 8.507059e+37 }
 0x163   :  { %v396_v42 = vsub.f32 1.0, %v395_v40 }
 0x165   :  { %v397_v44 = vmul.f32 %v520_v39, %v396_v42 }
 0x166   :  { %v522_v46 = vpop.eup %521 }
 0x167   :  { %v376_v47 = vmul.f32 %v522_v46, %v374_v37  ;;  %v398_v50 = vadd.f32 %v520_v39, %v397_v44  ;;  %vm381_vm2 = vweird.f32 %v522_v46 }
 0x168   :  { %vm382_vm5 = vmor %vm380_vm4, %vm381_vm2 }
 0x169   :  { %v377_v49 = vsub.f32 1.0, %v376_v47  ;;  %v402_v58 = vsel %vm401_vm3, %v520_v39, %v398_v50 }
 0x16a   :  { %v407_v63 = vsel %vm404_vm7, %v406_v59, %v402_v58 }
 0x16b   :  { %v378_v54 = vmul.f32 %v522_v46, %v377_v49  ;;  %v410_v3 = vsub.f32 1.0, %v407_v63 }
 0x16d   :  { %v379_v57 = vadd.f32 %v522_v46, %v378_v54 }
 0x16f   :  { %v383_v61 = vsel %vm382_vm5, %v522_v46, %v379_v57 }
 0x170   :  { %v388_v62 = vsel %vm385_vm6, %v387_v60, %v383_v61 }
 0x171   :  { %v411_v0 = vadd.f32 %v407_v63, %v388_v62  ;;  %v409_v1 = vsub.f32 1.0, %v388_v62 }
 0x173   :  { %506 = vmatmul.msk.f32.vlgmr.msra.gmra.mxu3 %vm412_vm8, %v411_v0  ;;  %v436_v4 = vadd.f32 %v410_v3, %v409_v1 }
 0x17b   :  { %507 = vmatmul.msk.f32.vlgmr.msrb.gmra.mxu3 %vm412_vm8, %v436_v4 }
 0x1f6   :  { %v433_v12 = vpop.f32.mrf.mxu3 }
 0x1f7   :  { %v460_v19 = vmul.f32 %v433_v12, %v225_v14 }
 0x1fe   :  { %v457_v16 = vpop.f32.mrf.mxu3 }
 0x1ff   :  { %v461_v20 = vmul.f32 %v457_v16, %v285_v15 }
 0x201   :  { %v462_v21 = vadd.f32 %v461_v20, %v460_v19 }
 0x203   :  { %483 = vmatmul.f32.vlgmr.msra.gmra.mxu2 %v462_v21 }
 0x286   :  { %v484_v2 = vpop.f32.mrf.mxu2 }
 0x287   :  { %v485_v23 = vadd.f32 %v514_v22, %v484_v2 }
 0x289   :  { %487 = vst [vmem:[#allocation8] sm:$0xff] %v485_v23 }
 0x28a   :  { %498 = dma.vmem_to_hbm [thread:$0]  %s494_s1, 128, %s496_s19, [#allocation4]  }
 0x28b   :  { %623 = dma.done.wait [#allocation4], 128  }
 0x28c   :  { %624 = vsyncadd [#allocation4], 4294967168 }
 0x28d   :  { %503 = vsyncpa [#allocation3], 1 }
 0x28e   :  { %504 = vsyncpa [#allocation6], 1 }
 0x28f   :  { %505 = vsyncpa [#allocation4], 1 }

</bundles_post_ra>
